<compile_context>
chip_gen: v7x
topology: tpu7x:2x2x1
jax: 0.10.0
libtpu: 0.0.40
codegen_flags: <defaults>
</compile_context>

<pallas_src>
import functools
import math

import jax
import jax.numpy as jnp
import numpy as np
from jax.experimental import pallas as pl
from jax.experimental.pallas import tpu as pltpu


def _round_up(n, m):
    return ((n + m - 1) // m) * m


# ----------------------------------------------------------------------------
# Fused FPLSTM kernel: LSTM recurrence + FC1 + ReLU + FC2.
# Grid = (batch tiles [parallel], time chunks [arbitrary]).
# h/c state and the per-chunk x-projections live in VMEM scratch.
# ----------------------------------------------------------------------------
def fplstm_kernel(x_ref, wih_ref, whh_ref, b_ref, w1_ref, b1_ref, w2_ref, b2_ref,
                  out_ref, xg_scr, h_scr, c_scr,
                  *, seq_len, time_chunk, batch_tile, hidden, unroll):
    TC, TB, H = time_chunk, batch_tile, hidden
    G = 4 * H
    D = x_ref.shape[-1]
    t_idx = pl.program_id(1)

    @pl.when(t_idx == 0)
    def _init():
        h_scr[...] = jnp.zeros_like(h_scr)
        c_scr[...] = jnp.zeros_like(c_scr)

    # ---- input projections for the whole chunk, all gates lane-packed -------
    # x block is (TC, TB, D) with TB a multiple of 8, so the merge reshape is a
    # pure relabel of sublane tiles.  One MXU matmul with M = TC*TB, N = 4H.
    x2d = x_ref[...].reshape(TC * TB, D)
    xg_scr[...] = (jnp.dot(x2d, wih_ref[...], preferred_element_type=jnp.float32)
                   + b_ref[...])

    whh = whh_ref[...]                                    # (H, 4H), hoisted
    # Gate order along lanes: (i, f, g, o).  tanh on the g lanes, sigmoid elsewhere.
    lane = jax.lax.broadcasted_iota(jnp.int32, (TB, G), 1)
    is_g = (lane >= 2 * H) & (lane < 3 * H)
    chunk_start = t_idx * TC
    mask_tail = (seq_len % time_chunk) != 0               # static: any padded steps?

    def step(t, carry):
        h, c = carry
        start = pl.multiple_of(t * TB, TB)                # sublane-aligned slice
        z = (xg_scr[pl.ds(start, TB), :]
             + jnp.dot(h, whh, preferred_element_type=jnp.float32))   # (TB, 4H)
        # One full-width EUP pass: sigmoid(z) = 0.5*(tanh(z/2)+1); tanh(z) on g lanes.
        th = jnp.tanh(jnp.where(is_g, z, 0.5 * z))
        gates = jnp.where(is_g, th, 0.5 * (th + 1.0))
        i_g = gates[:, 0 * H:1 * H]
        f_g = gates[:, 1 * H:2 * H]
        g_g = gates[:, 2 * H:3 * H]
        o_g = gates[:, 3 * H:4 * H]
        c_new = f_g * c + i_g * g_g
        h_new = o_g * jnp.tanh(c_new)
        if mask_tail:                                     # only emitted if T was padded
            keep = (chunk_start + t) < seq_len
            h_new = jnp.where(keep, h_new, h)
            c_new = jnp.where(keep, c_new, c)
        return h_new, c_new

    h, c = jax.lax.fori_loop(0, TC, step, (h_scr[...], c_scr[...]), unroll=unroll)
    h_scr[...] = h
    c_scr[...] = c

    # TODO(synk): train-mode dropout (pltpu.prng_*) not implemented; eval-mode
    # forward treats both Dropout layers as identity, matching model.eval().
    @pl.when(t_idx == pl.num_programs(1) - 1)
    def _finalize():
        fc1 = jnp.maximum(
            jnp.dot(h, w1_ref[...], preferred_element_type=jnp.float32) + b1_ref[...],
            0.0)
        out_ref[...] = (jnp.dot(fc1, w2_ref[...], preferred_element_type=jnp.float32)
                        + b2_ref[...])                    # lane-dense (TB, 128) store


# ----------------------------------------------------------------------------
# pallas_call wrapper
# ----------------------------------------------------------------------------
def fplstm_forward(x, params):
    """x: (T, B, input_size) float32  ->  (B, n_classes) float32."""
    T, B, D = x.shape
    wih, whh, b = params["wih"], params["whh"], params["b"]
    w1, b1, w2, b2 = params["w1"], params["b1"], params["w2"], params["b2"]
    C = params["n_classes"]
    H = whh.shape[0]
    G = whh.shape[1]                                      # 4H (lane-packed gates)
    F1 = w1.shape[-1]
    Cp = w2.shape[-1]                                     # n_classes padded to 128

    # Batch tile: sublane-aligned; guarantee >= 2 tiles once B >= 16 so both v7x
    # TensorCores get work via the "parallel" grid axis.
    if B >= 16:
        TB = min(128, _round_up(-(-B // 2), 8))
    else:
        TB = _round_up(B, 8)
    B_pad = _round_up(B, TB)

    # Time chunk: bounds the x-projection scratch to TC*TB*4H*4 bytes (<= 8 MiB at
    # TC=TB=128, 4H=128), independent of T -> fits v7x's 64 MiB VMEM at any T.
    TC = min(T, 128)
    T_pad = _round_up(T, TC)

    if B_pad != B or T_pad != T:
        x = jnp.pad(x, ((0, T_pad - T), (0, B_pad - B), (0, 0)))

    kernel = functools.partial(
        fplstm_kernel, seq_len=T, time_chunk=TC, batch_tile=TB, hidden=H,
        unroll=(TC if TC <= 16 else 8))

    out = pl.pallas_call(
        kernel,
        out_shape=jax.ShapeDtypeStruct((B_pad, Cp), jnp.float32),
        grid=(B_pad // TB, T_pad // TC),
        in_specs=[
            pl.BlockSpec((TC, TB, D), lambda i, t: (t, i, 0)),   # x (batch+time tiled)
            pl.BlockSpec((D, G), lambda i, t: (0, 0)),           # W_ih, gates on lanes
            pl.BlockSpec((H, G), lambda i, t: (0, 0)),           # W_hh, gates on lanes
            pl.BlockSpec((1, G), lambda i, t: (0, 0)),           # b_ih + b_hh folded
            pl.BlockSpec((H, F1), lambda i, t: (0, 0)),          # FC1 weight (H, F1)
            pl.BlockSpec((1, F1), lambda i, t: (0, 0)),          # FC1 bias
            pl.BlockSpec((F1, Cp), lambda i, t: (0, 0)),         # FC2 weight (F1, 128)
            pl.BlockSpec((1, Cp), lambda i, t: (0, 0)),          # FC2 bias (padded)
        ],
        out_specs=pl.BlockSpec((TB, Cp), lambda i, t: (i, 0)),
        scratch_shapes=[
            pltpu.VMEM((TC * TB, G), jnp.float32),               # chunk x-projections
            pltpu.VMEM((TB, H), jnp.float32),                    # h state (carried)
            pltpu.VMEM((TB, H), jnp.float32),                    # c state (carried)
        ],
        compiler_params=pltpu.CompilerParams(
            dimension_semantics=("parallel", "arbitrary"),
            vmem_limit_bytes=32 * 1024 * 1024),
    )(x, wih, whh, b, w1, b1, w2, b2)
    return out[:B, :C]


# ----------------------------------------------------------------------------
# Deterministic synthetic parameters (PyTorch layout) + conversion + reference
# ----------------------------------------------------------------------------
def init_torch_params(key, input_size, lstm_size, fc1_size, n_classes):
    ks = jax.random.split(key, 8)
    kl = 1.0 / math.sqrt(lstm_size)
    W_ih = jax.random.uniform(ks[0], (4 * lstm_size, input_size), jnp.float32, -kl, kl)
    W_hh = jax.random.uniform(ks[1], (4 * lstm_size, lstm_size), jnp.float32, -kl, kl)
    b_ih = jax.random.uniform(ks[2], (4 * lstm_size,), jnp.float32, -kl, kl)
    b_hh = jax.random.uniform(ks[3], (4 * lstm_size,), jnp.float32, -kl, kl)
    k1 = 1.0 / math.sqrt(lstm_size)
    fc1_w = jax.random.uniform(ks[4], (fc1_size, lstm_size), jnp.float32, -k1, k1)
    fc1_b = jax.random.uniform(ks[5], (fc1_size,), jnp.float32, -k1, k1)
    k2 = 1.0 / math.sqrt(fc1_size)
    fc2_w = jax.random.uniform(ks[6], (n_classes, fc1_size), jnp.float32, -k2, k2)
    fc2_b = jax.random.uniform(ks[7], (n_classes,), jnp.float32, -k2, k2)
    return dict(W_ih=W_ih, W_hh=W_hh, b_ih=b_ih, b_hh=b_hh,
                fc1_w=fc1_w, fc1_b=fc1_b, fc2_w=fc2_w, fc2_b=fc2_b)


def prepare_kernel_params(tp):
    """PyTorch-layout params -> kernel layout (gates lane-packed, transposed, padded)."""
    wih = tp["W_ih"].T                                    # (D, 4H), cols = [i|f|g|o]
    whh = tp["W_hh"].T                                    # (H, 4H)
    b = (tp["b_ih"] + tp["b_hh"]).reshape(1, -1)          # (1, 4H), biases folded
    w1 = tp["fc1_w"].T                                    # (H, F1)
    b1 = tp["fc1_b"].reshape(1, -1)
    C = tp["fc2_w"].shape[0]
    Cp = _round_up(C, 128)                                # lane-dense FC2 output
    w2 = jnp.pad(tp["fc2_w"].T, ((0, 0), (0, Cp - C)))    # (F1, 128)
    b2 = jnp.pad(tp["fc2_b"], (0, Cp - C)).reshape(1, -1)
    return dict(wih=wih, whh=whh, b=b, w1=w1, b1=b1, w2=w2, b2=b2, n_classes=C)


def fplstm_reference(x, tp):
    """Pure-JAX reference mirroring torch nn.LSTM + FC1/ReLU + FC2 (eval mode)."""
    T, B, _ = x.shape
    H = tp["W_hh"].shape[1]
    h = jnp.zeros((B, H), jnp.float32)
    c = jnp.zeros((B, H), jnp.float32)
    for t in range(T):
        z = x[t] @ tp["W_ih"].T + tp["b_ih"] + h @ tp["W_hh"].T + tp["b_hh"]
        i, f, g, o = jnp.split(z, 4, axis=1)
        i, f, o = jax.nn.sigmoid(i), jax.nn.sigmoid(f), jax.nn.sigmoid(o)
        g = jnp.tanh(g)
        c = f * c + i * g
        h = o * jnp.tanh(c)
    fc1 = jax.nn.relu(h @ tp["fc1_w"].T + tp["fc1_b"])
    return fc1 @ tp["fc2_w"].T + tp["fc2_b"]


if __name__ == "__main__":
    # FPLSTM(lstm_size=32, fc1_size=64, input_size=16, n_classes=2, dropout_prob=0.5)
    seq_len, batch, input_size = 8, 2, 16
    lstm_size, fc1_size, n_classes = 32, 64, 2

    key = jax.random.PRNGKey(0)
    kx, kp = jax.random.split(key)
    x = jax.random.normal(kx, (seq_len, batch, input_size), jnp.float32)

    torch_params = init_torch_params(kp, input_size, lstm_size, fc1_size, n_classes)
    kernel_params = prepare_kernel_params(torch_params)

    fwd = jax.jit(lambda inp: fplstm_forward(inp, kernel_params))
    out = jax.block_until_ready(fwd(x))
    assert out.shape == (batch, n_classes), out.shape

    ref = jax.block_until_ready(fplstm_reference(x, torch_params))
    np.testing.assert_allclose(np.asarray(out), np.asarray(ref), atol=2e-3, rtol=2e-3)
    print("KERNEL_OK")
</pallas_src>

<mosaic_0001>
module attributes {stable_mosaic.version = 11 : i64} {
  func.func @fplstm_kernel(%arg0: i32, %arg1: i32, %arg2: memref<8x8x16xf32, #tpu.memory_space<vmem>>, %arg3: memref<16x128xf32, #tpu.memory_space<vmem>>, %arg4: memref<32x128xf32, #tpu.memory_space<vmem>>, %arg5: memref<1x128xf32, #tpu.memory_space<vmem>>, %arg6: memref<32x64xf32, #tpu.memory_space<vmem>>, %arg7: memref<1x64xf32, #tpu.memory_space<vmem>>, %arg8: memref<64x128xf32, #tpu.memory_space<vmem>>, %arg9: memref<1x128xf32, #tpu.memory_space<vmem>>, %arg10: memref<8x128xf32, #tpu.memory_space<vmem>>, %arg11: memref<64x128xf32, #tpu.memory_space<vmem>>, %arg12: memref<8x32xf32, #tpu.memory_space<vmem>>, %arg13: memref<8x32xf32, #tpu.memory_space<vmem>>) attributes {dimension_semantics = [#tpu.dimension_semantics<parallel>, #tpu.dimension_semantics<arbitrary>], iteration_bounds = array<i64: 1, 1>, scalar_prefetch = 0 : i64, scratch_operands = 3 : i64, tpu.core_type = #tpu.core_type<tc>, window_params = [{transform_indices = @transform_0, window_bounds = array<i64: 8, 8, 16>}, {pipeline_mode = #tpu.pipeline_mode<synchronous>, transform_indices = @transform_1, window_bounds = array<i64: 16, 128>}, {pipeline_mode = #tpu.pipeline_mode<synchronous>, transform_indices = @transform_2, window_bounds = array<i64: 32, 128>}, {pipeline_mode = #tpu.pipeline_mode<synchronous>, transform_indices = @transform_3, window_bounds = array<i64: 1, 128>}, {pipeline_mode = #tpu.pipeline_mode<synchronous>, transform_indices = @transform_4, window_bounds = array<i64: 32, 64>}, {pipeline_mode = #tpu.pipeline_mode<synchronous>, transform_indices = @transform_5, window_bounds = array<i64: 1, 64>}, {pipeline_mode = #tpu.pipeline_mode<synchronous>, transform_indices = @transform_6, window_bounds = array<i64: 64, 128>}, {pipeline_mode = #tpu.pipeline_mode<synchronous>, transform_indices = @transform_7, window_bounds = array<i64: 1, 128>}, {transform_indices = @transform_8, window_bounds = array<i64: 8, 128>}]} {
    %c0_i32 = arith.constant 0 : i32
    %0 = arith.cmpi eq, %arg1, %c0_i32 : i32
    %1 = arith.extui %0 : i1 to i32
    %c0_i32_0 = arith.constant 0 : i32
    %2 = arith.cmpi ne, %1, %c0_i32_0 : i32
    scf.if %2 {
      %cst_70 = arith.constant 0.000000e+00 : f32
      %217 = vector.broadcast %cst_70 : f32 to vector<8x32xf32>
      %c0_71 = arith.constant 0 : index
      %c0_72 = arith.constant 0 : index
      %218 = vector.load %arg12[%c0_71, %c0_72] : memref<8x32xf32, #tpu.memory_space<vmem>>, vector<8x32xf32>
      tpu.vector_store %arg12[%c0_71, %c0_72], %217 {strides = array<i32>} : memref<8x32xf32, #tpu.memory_space<vmem>>, vector<8x32xf32>,
      %cst_73 = arith.constant 0.000000e+00 : f32
      %219 = vector.broadcast %cst_73 : f32 to vector<8x32xf32>
      %c0_74 = arith.constant 0 : index
      %c0_75 = arith.constant 0 : index
      %220 = vector.load %arg13[%c0_74, %c0_75] : memref<8x32xf32, #tpu.memory_space<vmem>>, vector<8x32xf32>
      tpu.vector_store %arg13[%c0_74, %c0_75], %219 {strides = array<i32>} : memref<8x32xf32, #tpu.memory_space<vmem>>, vector<8x32xf32>,
    } else {
    }
    %c0 = arith.constant 0 : index
    %c0_1 = arith.constant 0 : index
    %c0_2 = arith.constant 0 : index
    %3 = vector.load %arg2[%c0, %c0_1, %c0_2] : memref<8x8x16xf32, #tpu.memory_space<vmem>>, vector<8x8x16xf32>
    %4 = vector.shape_cast %3 : vector<8x8x16xf32> to vector<64x16xf32>
    %c0_3 = arith.constant 0 : index
    %c0_4 = arith.constant 0 : index
    %5 = vector.load %arg3[%c0_3, %c0_4] : memref<16x128xf32, #tpu.memory_space<vmem>>, vector<16x128xf32>
    %cst = arith.constant dense<0.000000e+00> : vector<64x128xf32>
    %6 = tpu.matmul %4, %5, %cst {dimension_numbers = #tpu.dot_dimension_numbers<[1], [0], [0], [1], [0, 0, 1, 1], [], []>} : vector<64x16xf32>, vector<16x128xf32>, vector<64x128xf32> -> vector<64x128xf32>
    %c0_5 = arith.constant 0 : index
    %c0_6 = arith.constant 0 : index
    %7 = vector.load %arg5[%c0_5, %c0_6] : memref<1x128xf32, #tpu.memory_space<vmem>>, vector<1x128xf32>
    %8 = vector.broadcast %7 : vector<1x128xf32> to vector<64x128xf32>
    %9 = arith.addf %6, %8 : vector<64x128xf32>
    %c0_7 = arith.constant 0 : index
    %c0_8 = arith.constant 0 : index
    %10 = vector.load %arg11[%c0_7, %c0_8] : memref<64x128xf32, #tpu.memory_space<vmem>>, vector<64x128xf32>
    tpu.vector_store %arg11[%c0_7, %c0_8], %9 {strides = array<i32>} : memref<64x128xf32, #tpu.memory_space<vmem>>, vector<64x128xf32>,
    %c0_9 = arith.constant 0 : index
    %c0_10 = arith.constant 0 : index
    %11 = vector.load %arg4[%c0_9, %c0_10] : memref<32x128xf32, #tpu.memory_space<vmem>>, vector<32x128xf32>
    %12 = tpu.iota {dimensions = array<i32: 1>} : vector<8x128xi32>
    %c64_i32 = arith.constant 64 : i32
    %13 = vector.broadcast %c64_i32 : i32 to vector<8x128xi32>
    %14 = arith.cmpi sge, %12, %13 : vector<8x128xi32>
    %c96_i32 = arith.constant 96 : i32
    %15 = vector.broadcast %c96_i32 : i32 to vector<8x128xi32>
    %16 = arith.cmpi slt, %12, %15 : vector<8x128xi32>
    %17 = arith.andi %14, %16 : vector<8x128xi1>
    %c0_11 = arith.constant 0 : index
    %c0_12 = arith.constant 0 : index
    %18 = vector.load %arg12[%c0_11, %c0_12] : memref<8x32xf32, #tpu.memory_space<vmem>>, vector<8x32xf32>
    %c0_13 = arith.constant 0 : index
    %c0_14 = arith.constant 0 : index
    %19 = vector.load %arg13[%c0_13, %c0_14] : memref<8x32xf32, #tpu.memory_space<vmem>>, vector<8x32xf32>
    %c0_i32_15 = arith.constant 0 : i32
    %c8_i32 = arith.constant 8 : i32
    %20 = arith.muli %c0_i32_15, %c8_i32 : i32
    %21 = tpu.assume_multiple %20, 8 : i32
    %22 = arith.index_cast %21 : i32 to index
    %c0_16 = arith.constant 0 : index
    %23 = vector.load %arg11[%22, %c0_16] : memref<64x128xf32, #tpu.memory_space<vmem>>, vector<8x128xf32>
    %cst_17 = arith.constant dense<0.000000e+00> : vector<8x128xf32>
    %24 = tpu.matmul %18, %11, %cst_17 {dimension_numbers = #tpu.dot_dimension_numbers<[1], [0], [0], [1], [0, 0, 1, 1], [], []>} : vector<8x32xf32>, vector<32x128xf32>, vector<8x128xf32> -> vector<8x128xf32>
    %25 = arith.addf %23, %24 : vector<8x128xf32>
    %cst_18 = arith.constant 5.000000e-01 : f32
    %26 = vector.broadcast %cst_18 : f32 to vector<8x128xf32>
    %27 = arith.mulf %26, %25 : vector<8x128xf32>
    %28 = arith.select %17, %25, %27 : vector<8x128xi1>, vector<8x128xf32>
    %29 = math.tanh %28 : vector<8x128xf32>
    %cst_19 = arith.constant 1.000000e+00 : f32
    %30 = vector.broadcast %cst_19 : f32 to vector<8x128xf32>
    %31 = arith.addf %29, %30 : vector<8x128xf32>
    %cst_20 = arith.constant 5.000000e-01 : f32
    %32 = vector.broadcast %cst_20 : f32 to vector<8x128xf32>
    %33 = arith.mulf %32, %31 : vector<8x128xf32>
    %34 = arith.select %17, %29, %33 : vector<8x128xi1>, vector<8x128xf32>
    %35 = vector.extract_strided_slice %34 {offsets = [0, 0], sizes = [8, 32], strides = [1, 1]} : vector<8x128xf32> to vector<8x32xf32>
    %36 = vector.extract_strided_slice %34 {offsets = [0, 32], sizes = [8, 32], strides = [1, 1]} : vector<8x128xf32> to vector<8x32xf32>
    %37 = vector.extract_strided_slice %34 {offsets = [0, 64], sizes = [8, 32], strides = [1, 1]} : vector<8x128xf32> to vector<8x32xf32>
    %38 = vector.extract_strided_slice %34 {offsets = [0, 96], sizes = [8, 32], strides = [1, 1]} : vector<8x128xf32> to vector<8x32xf32>
    %39 = arith.mulf %36, %19 : vector<8x32xf32>
    %40 = arith.mulf %35, %37 : vector<8x32xf32>
    %41 = arith.addf %39, %40 : vector<8x32xf32>
    %42 = math.tanh %41 : vector<8x32xf32>
    %43 = arith.mulf %38, %42 : vector<8x32xf32>
    %c1_i32 = arith.constant 1 : i32
    %c8_i32_21 = arith.constant 8 : i32
    %44 = arith.muli %c1_i32, %c8_i32_21 : i32
    %45 = tpu.assume_multiple %44, 8 : i32
    %46 = arith.index_cast %45 : i32 to index
    %c0_22 = arith.constant 0 : index
    %47 = vector.load %arg11[%46, %c0_22] : memref<64x128xf32, #tpu.memory_space<vmem>>, vector<8x128xf32>
    %cst_23 = arith.constant dense<0.000000e+00> : vector<8x128xf32>
    %48 = tpu.matmul %43, %11, %cst_23 {dimension_numbers = #tpu.dot_dimension_numbers<[1], [0], [0], [1], [0, 0, 1, 1], [], []>} : vector<8x32xf32>, vector<32x128xf32>, vector<8x128xf32> -> vector<8x128xf32>
    %49 = arith.addf %47, %48 : vector<8x128xf32>
    %cst_24 = arith.constant 5.000000e-01 : f32
    %50 = vector.broadcast %cst_24 : f32 to vector<8x128xf32>
    %51 = arith.mulf %50, %49 : vector<8x128xf32>
    %52 = arith.select %17, %49, %51 : vector<8x128xi1>, vector<8x128xf32>
    %53 = math.tanh %52 : vector<8x128xf32>
    %cst_25 = arith.constant 1.000000e+00 : f32
    %54 = vector.broadcast %cst_25 : f32 to vector<8x128xf32>
    %55 = arith.addf %53, %54 : vector<8x128xf32>
    %cst_26 = arith.constant 5.000000e-01 : f32
    %56 = vector.broadcast %cst_26 : f32 to vector<8x128xf32>
    %57 = arith.mulf %56, %55 : vector<8x128xf32>
    %58 = arith.select %17, %53, %57 : vector<8x128xi1>, vector<8x128xf32>
    %59 = vector.extract_strided_slice %58 {offsets = [0, 0], sizes = [8, 32], strides = [1, 1]} : vector<8x128xf32> to vector<8x32xf32>
    %60 = vector.extract_strided_slice %58 {offsets = [0, 32], sizes = [8, 32], strides = [1, 1]} : vector<8x128xf32> to vector<8x32xf32>
    %61 = vector.extract_strided_slice %58 {offsets = [0, 64], sizes = [8, 32], strides = [1, 1]} : vector<8x128xf32> to vector<8x32xf32>
    %62 = vector.extract_strided_slice %58 {offsets = [0, 96], sizes = [8, 32], strides = [1, 1]} : vector<8x128xf32> to vector<8x32xf32>
    %63 = arith.mulf %60, %41 : vector<8x32xf32>
    %64 = arith.mulf %59, %61 : vector<8x32xf32>
    %65 = arith.addf %63, %64 : vector<8x32xf32>
    %66 = math.tanh %65 : vector<8x32xf32>
    %67 = arith.mulf %62, %66 : vector<8x32xf32>
    %c2_i32 = arith.constant 2 : i32
    %c8_i32_27 = arith.constant 8 : i32
    %68 = arith.muli %c2_i32, %c8_i32_27 : i32
    %69 = tpu.assume_multiple %68, 8 : i32
    %70 = arith.index_cast %69 : i32 to index
    %c0_28 = arith.constant 0 : index
    %71 = vector.load %arg11[%70, %c0_28] : memref<64x128xf32, #tpu.memory_space<vmem>>, vector<8x128xf32>
    %cst_29 = arith.constant dense<0.000000e+00> : vector<8x128xf32>
    %72 = tpu.matmul %67, %11, %cst_29 {dimension_numbers = #tpu.dot_dimension_numbers<[1], [0], [0], [1], [0, 0, 1, 1], [], []>} : vector<8x32xf32>, vector<32x128xf32>, vector<8x128xf32> -> vector<8x128xf32>
    %73 = arith.addf %71, %72 : vector<8x128xf32>
    %cst_30 = arith.constant 5.000000e-01 : f32
    %74 = vector.broadcast %cst_30 : f32 to vector<8x128xf32>
    %75 = arith.mulf %74, %73 : vector<8x128xf32>
    %76 = arith.select %17, %73, %75 : vector<8x128xi1>, vector<8x128xf32>
    %77 = math.tanh %76 : vector<8x128xf32>
    %cst_31 = arith.constant 1.000000e+00 : f32
    %78 = vector.broadcast %cst_31 : f32 to vector<8x128xf32>
    %79 = arith.addf %77, %78 : vector<8x128xf32>
    %cst_32 = arith.constant 5.000000e-01 : f32
    %80 = vector.broadcast %cst_32 : f32 to vector<8x128xf32>
    %81 = arith.mulf %80, %79 : vector<8x128xf32>
    %82 = arith.select %17, %77, %81 : vector<8x128xi1>, vector<8x128xf32>
    %83 = vector.extract_strided_slice %82 {offsets = [0, 0], sizes = [8, 32], strides = [1, 1]} : vector<8x128xf32> to vector<8x32xf32>
    %84 = vector.extract_strided_slice %82 {offsets = [0, 32], sizes = [8, 32], strides = [1, 1]} : vector<8x128xf32> to vector<8x32xf32>
    %85 = vector.extract_strided_slice %82 {offsets = [0, 64], sizes = [8, 32], strides = [1, 1]} : vector<8x128xf32> to vector<8x32xf32>
    %86 = vector.extract_strided_slice %82 {offsets = [0, 96], sizes = [8, 32], strides = [1, 1]} : vector<8x128xf32> to vector<8x32xf32>
    %87 = arith.mulf %84, %65 : vector<8x32xf32>
    %88 = arith.mulf %83, %85 : vector<8x32xf32>
    %89 = arith.addf %87, %88 : vector<8x32xf32>
    %90 = math.tanh %89 : vector<8x32xf32>
    %91 = arith.mulf %86, %90 : vector<8x32xf32>
    %c3_i32 = arith.constant 3 : i32
    %c8_i32_33 = arith.constant 8 : i32
    %92 = arith.muli %c3_i32, %c8_i32_33 : i32
    %93 = tpu.assume_multiple %92, 8 : i32
    %94 = arith.index_cast %93 : i32 to index
    %c0_34 = arith.constant 0 : index
    %95 = vector.load %arg11[%94, %c0_34] : memref<64x128xf32, #tpu.memory_space<vmem>>, vector<8x128xf32>
    %cst_35 = arith.constant dense<0.000000e+00> : vector<8x128xf32>
    %96 = tpu.matmul %91, %11, %cst_35 {dimension_numbers = #tpu.dot_dimension_numbers<[1], [0], [0], [1], [0, 0, 1, 1], [], []>} : vector<8x32xf32>, vector<32x128xf32>, vector<8x128xf32> -> vector<8x128xf32>
    %97 = arith.addf %95, %96 : vector<8x128xf32>
    %cst_36 = arith.constant 5.000000e-01 : f32
    %98 = vector.broadcast %cst_36 : f32 to vector<8x128xf32>
    %99 = arith.mulf %98, %97 : vector<8x128xf32>
    %100 = arith.select %17, %97, %99 : vector<8x128xi1>, vector<8x128xf32>
    %101 = math.tanh %100 : vector<8x128xf32>
    %cst_37 = arith.constant 1.000000e+00 : f32
    %102 = vector.broadcast %cst_37 : f32 to vector<8x128xf32>
    %103 = arith.addf %101, %102 : vector<8x128xf32>
    %cst_38 = arith.constant 5.000000e-01 : f32
    %104 = vector.broadcast %cst_38 : f32 to vector<8x128xf32>
    %105 = arith.mulf %104, %103 : vector<8x128xf32>
    %106 = arith.select %17, %101, %105 : vector<8x128xi1>, vector<8x128xf32>
    %107 = vector.extract_strided_slice %106 {offsets = [0, 0], sizes = [8, 32], strides = [1, 1]} : vector<8x128xf32> to vector<8x32xf32>
    %108 = vector.extract_strided_slice %106 {offsets = [0, 32], sizes = [8, 32], strides = [1, 1]} : vector<8x128xf32> to vector<8x32xf32>
    %109 = vector.extract_strided_slice %106 {offsets = [0, 64], sizes = [8, 32], strides = [1, 1]} : vector<8x128xf32> to vector<8x32xf32>
    %110 = vector.extract_strided_slice %106 {offsets = [0, 96], sizes = [8, 32], strides = [1, 1]} : vector<8x128xf32> to vector<8x32xf32>
    %111 = arith.mulf %108, %89 : vector<8x32xf32>
    %112 = arith.mulf %107, %109 : vector<8x32xf32>
    %113 = arith.addf %111, %112 : vector<8x32xf32>
    %114 = math.tanh %113 : vector<8x32xf32>
    %115 = arith.mulf %110, %114 : vector<8x32xf32>
    %c4_i32 = arith.constant 4 : i32
    %c8_i32_39 = arith.constant 8 : i32
    %116 = arith.muli %c4_i32, %c8_i32_39 : i32
    %117 = tpu.assume_multiple %116, 8 : i32
    %118 = arith.index_cast %117 : i32 to index
    %c0_40 = arith.constant 0 : index
    %119 = vector.load %arg11[%118, %c0_40] : memref<64x128xf32, #tpu.memory_space<vmem>>, vector<8x128xf32>
    %cst_41 = arith.constant dense<0.000000e+00> : vector<8x128xf32>
    %120 = tpu.matmul %115, %11, %cst_41 {dimension_numbers = #tpu.dot_dimension_numbers<[1], [0], [0], [1], [0, 0, 1, 1], [], []>} : vector<8x32xf32>, vector<32x128xf32>, vector<8x128xf32> -> vector<8x128xf32>
    %121 = arith.addf %119, %120 : vector<8x128xf32>
    %cst_42 = arith.constant 5.000000e-01 : f32
    %122 = vector.broadcast %cst_42 : f32 to vector<8x128xf32>
    %123 = arith.mulf %122, %121 : vector<8x128xf32>
    %124 = arith.select %17, %121, %123 : vector<8x128xi1>, vector<8x128xf32>
    %125 = math.tanh %124 : vector<8x128xf32>
    %cst_43 = arith.constant 1.000000e+00 : f32
    %126 = vector.broadcast %cst_43 : f32 to vector<8x128xf32>
    %127 = arith.addf %125, %126 : vector<8x128xf32>
    %cst_44 = arith.constant 5.000000e-01 : f32
    %128 = vector.broadcast %cst_44 : f32 to vector<8x128xf32>
    %129 = arith.mulf %128, %127 : vector<8x128xf32>
    %130 = arith.select %17, %125, %129 : vector<8x128xi1>, vector<8x128xf32>
    %131 = vector.extract_strided_slice %130 {offsets = [0, 0], sizes = [8, 32], strides = [1, 1]} : vector<8x128xf32> to vector<8x32xf32>
    %132 = vector.extract_strided_slice %130 {offsets = [0, 32], sizes = [8, 32], strides = [1, 1]} : vector<8x128xf32> to vector<8x32xf32>
    %133 = vector.extract_strided_slice %130 {offsets = [0, 64], sizes = [8, 32], strides = [1, 1]} : vector<8x128xf32> to vector<8x32xf32>
    %134 = vector.extract_strided_slice %130 {offsets = [0, 96], sizes = [8, 32], strides = [1, 1]} : vector<8x128xf32> to vector<8x32xf32>
    %135 = arith.mulf %132, %113 : vector<8x32xf32>
    %136 = arith.mulf %131, %133 : vector<8x32xf32>
    %137 = arith.addf %135, %136 : vector<8x32xf32>
    %138 = math.tanh %137 : vector<8x32xf32>
    %139 = arith.mulf %134, %138 : vector<8x32xf32>
    %c5_i32 = arith.constant 5 : i32
    %c8_i32_45 = arith.constant 8 : i32
    %140 = arith.muli %c5_i32, %c8_i32_45 : i32
    %141 = tpu.assume_multiple %140, 8 : i32
    %142 = arith.index_cast %141 : i32 to index
    %c0_46 = arith.constant 0 : index
    %143 = vector.load %arg11[%142, %c0_46] : memref<64x128xf32, #tpu.memory_space<vmem>>, vector<8x128xf32>
    %cst_47 = arith.constant dense<0.000000e+00> : vector<8x128xf32>
    %144 = tpu.matmul %139, %11, %cst_47 {dimension_numbers = #tpu.dot_dimension_numbers<[1], [0], [0], [1], [0, 0, 1, 1], [], []>} : vector<8x32xf32>, vector<32x128xf32>, vector<8x128xf32> -> vector<8x128xf32>
    %145 = arith.addf %143, %144 : vector<8x128xf32>
    %cst_48 = arith.constant 5.000000e-01 : f32
    %146 = vector.broadcast %cst_48 : f32 to vector<8x128xf32>
    %147 = arith.mulf %146, %145 : vector<8x128xf32>
    %148 = arith.select %17, %145, %147 : vector<8x128xi1>, vector<8x128xf32>
    %149 = math.tanh %148 : vector<8x128xf32>
    %cst_49 = arith.constant 1.000000e+00 : f32
    %150 = vector.broadcast %cst_49 : f32 to vector<8x128xf32>
    %151 = arith.addf %149, %150 : vector<8x128xf32>
    %cst_50 = arith.constant 5.000000e-01 : f32
    %152 = vector.broadcast %cst_50 : f32 to vector<8x128xf32>
    %153 = arith.mulf %152, %151 : vector<8x128xf32>
    %154 = arith.select %17, %149, %153 : vector<8x128xi1>, vector<8x128xf32>
    %155 = vector.extract_strided_slice %154 {offsets = [0, 0], sizes = [8, 32], strides = [1, 1]} : vector<8x128xf32> to vector<8x32xf32>
    %156 = vector.extract_strided_slice %154 {offsets = [0, 32], sizes = [8, 32], strides = [1, 1]} : vector<8x128xf32> to vector<8x32xf32>
    %157 = vector.extract_strided_slice %154 {offsets = [0, 64], sizes = [8, 32], strides = [1, 1]} : vector<8x128xf32> to vector<8x32xf32>
    %158 = vector.extract_strided_slice %154 {offsets = [0, 96], sizes = [8, 32], strides = [1, 1]} : vector<8x128xf32> to vector<8x32xf32>
    %159 = arith.mulf %156, %137 : vector<8x32xf32>
    %160 = arith.mulf %155, %157 : vector<8x32xf32>
    %161 = arith.addf %159, %160 : vector<8x32xf32>
    %162 = math.tanh %161 : vector<8x32xf32>
    %163 = arith.mulf %158, %162 : vector<8x32xf32>
    %c6_i32 = arith.constant 6 : i32
    %c8_i32_51 = arith.constant 8 : i32
    %164 = arith.muli %c6_i32, %c8_i32_51 : i32
    %165 = tpu.assume_multiple %164, 8 : i32
    %166 = arith.index_cast %165 : i32 to index
    %c0_52 = arith.constant 0 : index
    %167 = vector.load %arg11[%166, %c0_52] : memref<64x128xf32, #tpu.memory_space<vmem>>, vector<8x128xf32>
    %cst_53 = arith.constant dense<0.000000e+00> : vector<8x128xf32>
    %168 = tpu.matmul %163, %11, %cst_53 {dimension_numbers = #tpu.dot_dimension_numbers<[1], [0], [0], [1], [0, 0, 1, 1], [], []>} : vector<8x32xf32>, vector<32x128xf32>, vector<8x128xf32> -> vector<8x128xf32>
    %169 = arith.addf %167, %168 : vector<8x128xf32>
    %cst_54 = arith.constant 5.000000e-01 : f32
    %170 = vector.broadcast %cst_54 : f32 to vector<8x128xf32>
    %171 = arith.mulf %170, %169 : vector<8x128xf32>
    %172 = arith.select %17, %169, %171 : vector<8x128xi1>, vector<8x128xf32>
    %173 = math.tanh %172 : vector<8x128xf32>
    %cst_55 = arith.constant 1.000000e+00 : f32
    %174 = vector.broadcast %cst_55 : f32 to vector<8x128xf32>
    %175 = arith.addf %173, %174 : vector<8x128xf32>
    %cst_56 = arith.constant 5.000000e-01 : f32
    %176 = vector.broadcast %cst_56 : f32 to vector<8x128xf32>
    %177 = arith.mulf %176, %175 : vector<8x128xf32>
    %178 = arith.select %17, %173, %177 : vector<8x128xi1>, vector<8x128xf32>
    %179 = vector.extract_strided_slice %178 {offsets = [0, 0], sizes = [8, 32], strides = [1, 1]} : vector<8x128xf32> to vector<8x32xf32>
    %180 = vector.extract_strided_slice %178 {offsets = [0, 32], sizes = [8, 32], strides = [1, 1]} : vector<8x128xf32> to vector<8x32xf32>
    %181 = vector.extract_strided_slice %178 {offsets = [0, 64], sizes = [8, 32], strides = [1, 1]} : vector<8x128xf32> to vector<8x32xf32>
    %182 = vector.extract_strided_slice %178 {offsets = [0, 96], sizes = [8, 32], strides = [1, 1]} : vector<8x128xf32> to vector<8x32xf32>
    %183 = arith.mulf %180, %161 : vector<8x32xf32>
    %184 = arith.mulf %179, %181 : vector<8x32xf32>
    %185 = arith.addf %183, %184 : vector<8x32xf32>
    %186 = math.tanh %185 : vector<8x32xf32>
    %187 = arith.mulf %182, %186 : vector<8x32xf32>
    %c7_i32 = arith.constant 7 : i32
    %c8_i32_57 = arith.constant 8 : i32
    %188 = arith.muli %c7_i32, %c8_i32_57 : i32
    %189 = tpu.assume_multiple %188, 8 : i32
    %190 = arith.index_cast %189 : i32 to index
    %c0_58 = arith.constant 0 : index
    %191 = vector.load %arg11[%190, %c0_58] : memref<64x128xf32, #tpu.memory_space<vmem>>, vector<8x128xf32>
    %cst_59 = arith.constant dense<0.000000e+00> : vector<8x128xf32>
    %192 = tpu.matmul %187, %11, %cst_59 {dimension_numbers = #tpu.dot_dimension_numbers<[1], [0], [0], [1], [0, 0, 1, 1], [], []>} : vector<8x32xf32>, vector<32x128xf32>, vector<8x128xf32> -> vector<8x128xf32>
    %193 = arith.addf %191, %192 : vector<8x128xf32>
    %cst_60 = arith.constant 5.000000e-01 : f32
    %194 = vector.broadcast %cst_60 : f32 to vector<8x128xf32>
    %195 = arith.mulf %194, %193 : vector<8x128xf32>
    %196 = arith.select %17, %193, %195 : vector<8x128xi1>, vector<8x128xf32>
    %197 = math.tanh %196 : vector<8x128xf32>
    %cst_61 = arith.constant 1.000000e+00 : f32
    %198 = vector.broadcast %cst_61 : f32 to vector<8x128xf32>
    %199 = arith.addf %197, %198 : vector<8x128xf32>
    %cst_62 = arith.constant 5.000000e-01 : f32
    %200 = vector.broadcast %cst_62 : f32 to vector<8x128xf32>
    %201 = arith.mulf %200, %199 : vector<8x128xf32>
    %202 = arith.select %17, %197, %201 : vector<8x128xi1>, vector<8x128xf32>
    %203 = vector.extract_strided_slice %202 {offsets = [0, 0], sizes = [8, 32], strides = [1, 1]} : vector<8x128xf32> to vector<8x32xf32>
    %204 = vector.extract_strided_slice %202 {offsets = [0, 32], sizes = [8, 32], strides = [1, 1]} : vector<8x128xf32> to vector<8x32xf32>
    %205 = vector.extract_strided_slice %202 {offsets = [0, 64], sizes = [8, 32], strides = [1, 1]} : vector<8x128xf32> to vector<8x32xf32>
    %206 = vector.extract_strided_slice %202 {offsets = [0, 96], sizes = [8, 32], strides = [1, 1]} : vector<8x128xf32> to vector<8x32xf32>
    %207 = arith.mulf %204, %185 : vector<8x32xf32>
    %208 = arith.mulf %203, %205 : vector<8x32xf32>
    %209 = arith.addf %207, %208 : vector<8x32xf32>
    %210 = math.tanh %209 : vector<8x32xf32>
    %211 = arith.mulf %206, %210 : vector<8x32xf32>
    %c8_i32_63 = arith.constant 8 : i32
    %c0_64 = arith.constant 0 : index
    %c0_65 = arith.constant 0 : index
    %212 = vector.load %arg12[%c0_64, %c0_65] : memref<8x32xf32, #tpu.memory_space<vmem>>, vector<8x32xf32>
    tpu.vector_store %arg12[%c0_64, %c0_65], %211 {strides = array<i32>} : memref<8x32xf32, #tpu.memory_space<vmem>>, vector<8x32xf32>,
    %c0_66 = arith.constant 0 : index
    %c0_67 = arith.constant 0 : index
    %213 = vector.load %arg13[%c0_66, %c0_67] : memref<8x32xf32, #tpu.memory_space<vmem>>, vector<8x32xf32>
    tpu.vector_store %arg13[%c0_66, %c0_67], %209 {strides = array<i32>} : memref<8x32xf32, #tpu.memory_space<vmem>>, vector<8x32xf32>,
    %c0_i32_68 = arith.constant 0 : i32
    %214 = arith.cmpi eq, %arg1, %c0_i32_68 : i32
    %215 = arith.extui %214 : i1 to i32
    %c0_i32_69 = arith.constant 0 : i32
    %216 = arith.cmpi ne, %215, %c0_i32_69 : i32
    scf.if %216 {
      %c0_70 = arith.constant 0 : index
      %c0_71 = arith.constant 0 : index
      %217 = vector.load %arg6[%c0_70, %c0_71] : memref<32x64xf32, #tpu.memory_space<vmem>>, vector<32x64xf32>
      %cst_72 = arith.constant dense<0.000000e+00> : vector<8x64xf32>
      %218 = tpu.matmul %211, %217, %cst_72 {dimension_numbers = #tpu.dot_dimension_numbers<[1], [0], [0], [1], [0, 0, 1, 1], [], []>} : vector<8x32xf32>, vector<32x64xf32>, vector<8x64xf32> -> vector<8x64xf32>
      %c0_73 = arith.constant 0 : index
      %c0_74 = arith.constant 0 : index
      %219 = vector.load %arg7[%c0_73, %c0_74] : memref<1x64xf32, #tpu.memory_space<vmem>>, vector<1x64xf32>
      %220 = vector.broadcast %219 : vector<1x64xf32> to vector<8x64xf32>
      %221 = arith.addf %218, %220 : vector<8x64xf32>
      %cst_75 = arith.constant 0.000000e+00 : f32
      %222 = vector.broadcast %cst_75 : f32 to vector<8x64xf32>
      %223 = arith.maximumf %221, %222 : vector<8x64xf32>
      %c0_76 = arith.constant 0 : index
      %c0_77 = arith.constant 0 : index
      %224 = vector.load %arg8[%c0_76, %c0_77] : memref<64x128xf32, #tpu.memory_space<vmem>>, vector<64x128xf32>
      %cst_78 = arith.constant dense<0.000000e+00> : vector<8x128xf32>
      %225 = tpu.matmul %223, %224, %cst_78 {dimension_numbers = #tpu.dot_dimension_numbers<[1], [0], [0], [1], [0, 0, 1, 1], [], []>} : vector<8x64xf32>, vector<64x128xf32>, vector<8x128xf32> -> vector<8x128xf32>
      %c0_79 = arith.constant 0 : index
      %c0_80 = arith.constant 0 : index
      %226 = vector.load %arg9[%c0_79, %c0_80] : memref<1x128xf32, #tpu.memory_space<vmem>>, vector<1x128xf32>
      %227 = vector.broadcast %226 : vector<1x128xf32> to vector<8x128xf32>
      %228 = arith.addf %225, %227 : vector<8x128xf32>
      %c0_81 = arith.constant 0 : index
      %c0_82 = arith.constant 0 : index
      %229 = vector.load %arg10[%c0_81, %c0_82] : memref<8x128xf32, #tpu.memory_space<vmem>>, vector<8x128xf32>
      tpu.vector_store %arg10[%c0_81, %c0_82], %228 {strides = array<i32>} : memref<8x128xf32, #tpu.memory_space<vmem>>, vector<8x128xf32>,
    } else {
    }
    return
  }
  func.func @transform_0(%arg0: i32, %arg1: i32) -> (i32, i32, i32) {
    %c0_i32 = arith.constant 0 : i32
    %c0_i32_0 = arith.constant 0 : i32
    return %arg1, %arg0, %c0_i32 : i32, i32, i32
  }
  func.func @transform_1(%arg0: i32, %arg1: i32) -> (i32, i32) {
    %c0_i32 = arith.constant 0 : i32
    %c0_i32_0 = arith.constant 0 : i32
    %c0_i32_1 = arith.constant 0 : i32
    return %c0_i32, %c0_i32_0 : i32, i32
  }
  func.func @transform_2(%arg0: i32, %arg1: i32) -> (i32, i32) {
    %c0_i32 = arith.constant 0 : i32
    %c0_i32_0 = arith.constant 0 : i32
    %c0_i32_1 = arith.constant 0 : i32
    return %c0_i32, %c0_i32_0 : i32, i32
  }
  func.func @transform_3(%arg0: i32, %arg1: i32) -> (i32, i32) {
    %c0_i32 = arith.constant 0 : i32
    %c0_i32_0 = arith.constant 0 : i32
    %c0_i32_1 = arith.constant 0 : i32
    return %c0_i32, %c0_i32_0 : i32, i32
  }
  func.func @transform_4(%arg0: i32, %arg1: i32) -> (i32, i32) {
    %c0_i32 = arith.constant 0 : i32
    %c0_i32_0 = arith.constant 0 : i32
    %c0_i32_1 = arith.constant 0 : i32
    return %c0_i32, %c0_i32_0 : i32, i32
  }
  func.func @transform_5(%arg0: i32, %arg1: i32) -> (i32, i32) {
    %c0_i32 = arith.constant 0 : i32
    %c0_i32_0 = arith.constant 0 : i32
    %c0_i32_1 = arith.constant 0 : i32
    return %c0_i32, %c0_i32_0 : i32, i32
  }
  func.func @transform_6(%arg0: i32, %arg1: i32) -> (i32, i32) {
    %c0_i32 = arith.constant 0 : i32
    %c0_i32_0 = arith.constant 0 : i32
    %c0_i32_1 = arith.constant 0 : i32
    return %c0_i32, %c0_i32_0 : i32, i32
  }
  func.func @transform_7(%arg0: i32, %arg1: i32) -> (i32, i32) {
    %c0_i32 = arith.constant 0 : i32
    %c0_i32_0 = arith.constant 0 : i32
    %c0_i32_1 = arith.constant 0 : i32
    return %c0_i32, %c0_i32_0 : i32, i32
  }
  func.func @transform_8(%arg0: i32, %arg1: i32) -> (i32, i32) {
    %c0_i32 = arith.constant 0 : i32
    %c0_i32_0 = arith.constant 0 : i32
    return %arg0, %c0_i32 : i32, i32
  }
}

</mosaic_0001>

<bundles_post_ra>
// kernel: _lambda_.1
= control target key start
LH: loop header
LB: loop body
LE: loop exit
PB: predicated region body
PF: predicated region fallthrough
CT: control target
= control target key end

     0   :  { %13 = vsyncpa [#allocation6], 0  ;;  %s1935_s0 = inlined_call_operand.vmem [shape: f32[8,8,16], index: 0, kind: input, shape index: {}]   ;;  %s1936_s1 = inlined_call_operand.hbm [shape: f32[16,128], index: 1, kind: input, shape index: {}]   ;;  %s1937_s2 = inlined_call_operand.hbm [shape: f32[32,128], index: 2, kind: input, shape index: {}]   ;;  %s1938_s3 = inlined_call_operand.vmem [shape: f32[1,128], index: 3, kind: input, shape index: {}]   ;;  %s1939_s4 = inlined_call_operand.vmem [shape: f32[32,64], index: 4, kind: input, shape index: {}]   ;;  %s1940_s5 = inlined_call_operand.vmem [shape: f32[1,64], index: 5, kind: input, shape index: {}]   ;;  %s1941_s6 = inlined_call_operand.vmem [shape: f32[64,128], index: 6, kind: input, shape index: {}]   ;;  %s1942_s7 = inlined_call_operand.vmem [shape: f32[1,128], index: 7, kind: input, shape index: {}]   ;;  %s1943_s8 = inlined_call_operand.vmem [shape: f32[8,128], index: 8, kind: output, shape index: {}]  }
   0x1   :  { %14 = vsyncpa [#allocation8], 0  ;;  %s1612_s27 = smov [#allocation5]   ;;  %s1564_s9 = scalar_lea.hbm %s1936_s1, 256 }
   0x2   :  { %s22_s28 = sshll.u32 %s1612_s27, 4  ;;  %p1565_p0 = scmp.ne.s32.totalorder %s1936_s1, %s1564_s9  ;;  %s23_s28 = int_to_ptr.vmem [resolvable:$true] %s22_s28 }
   0x3   :  { %p1568_p1 = scmp.lt.u32.totalorder %s1564_s9, %s1936_s1 }
   0x5   :  { %p1570_p2 = pnand %p1568_p1, %p1565_p0 }
   0x7   :  { %1573 = shalt.err (!%p1570_p2)
}
   0x8   :  { %s1574_s14 = scalar_lea.vmem %s23_s28, 256  ;;  %p1579_p4 = scmp.lt.s32.totalorder %s23_s28, %s23_s28 }
   0x9   :  { %p1575_p3 = scmp.ne.s32.totalorder %s23_s28, %s1574_s14  ;;  %p1580_p5 = scmp.lt.s32.totalorder %s1574_s14, %s1574_s14 }
   0xb   :  { %p1581_p6 = por %p1580_p5, %p1579_p4 }
   0xd   :  { %p1582_p7 = pnand %p1581_p6, %p1575_p3 }
   0xf   :  { %1585 = shalt.err (!%p1582_p7)
}
  0x10   :  { %s1613_s15 = smov 128   ;;  %s1614_s16 = smov 8  }
  0x11   :  { %28 = dma.hbm_to_vmem [thread:$0]  %s1936_s1, 256, %s23_s28, [#allocation6], %s1613_s15, %s1613_s15, %s1614_s16  }
  0x12   :  { %s1615_s19 = smov [#allocation7]   ;;  %s1586_s23 = scalar_lea.hbm %s1937_s2, 512 }
  0x13   :  { %s34_s20 = sshll.u32 %s1615_s19, 4  ;;  %p1587_p8 = scmp.ne.s32.totalorder %s1937_s2, %s1586_s23  ;;  %s35_s20 = int_to_ptr.vmem [resolvable:$true] %s34_s20 }
  0x14   :  { %p1590_p9 = scmp.lt.u32.totalorder %s1586_s23, %s1937_s2 }
  0x16   :  { %p1592_p10 = pnand %p1590_p9, %p1587_p8 }
  0x18   :  { %1595 = shalt.err (!%p1592_p10)
}
  0x19   :  { %s1596_s29 = scalar_lea.vmem %s35_s20, 512  ;;  %p1601_p12 = scmp.lt.s32.totalorder %s35_s20, %s35_s20 }
  0x1a   :  { %p1597_p11 = scmp.ne.s32.totalorder %s35_s20, %s1596_s29  ;;  %p1602_p13 = scmp.lt.s32.totalorder %s1596_s29, %s1596_s29 }
  0x1c   :  { %p1603_p0 = por %p1602_p13, %p1601_p12 }
  0x1e   :  { %p1604_p1 = pnand %p1603_p0, %p1597_p11 }
  0x20   :  { %1607 = shalt.err (!%p1604_p1)
}
  0x21   :  { %40 = dma.hbm_to_vmem [thread:$0]  %s1937_s2, 512, %s35_s20, [#allocation8], %s1613_s15, %s1613_s15, %s1614_s16  }
  0x22   :  { %1608 = dma.done.wait [#allocation6], 256  }
  0x23   :  { %1609 = vsyncadd [#allocation6], 4294967040 }
  0x24   :  { %1610 = dma.done.wait [#allocation8], 512  }
  0x25   :  { %1611 = vsyncadd [#allocation8], 4294966784  ;;  %vm61_vm0 = vcmask 261120   ;;  %v1616_v0 = vmov 0.0|0.0   ;;  %vm1617_vm1 = vmmov 0   ;;  %v1618_v1 = vmov 0.0  }
  0x26   :  { %1462 = vmatprep.subr.bf16.mxu1 %v1616_v0  ;;  %1353 = vmatprep.mubr.msk.f32.mxu1 %vm1617_vm1, %v1618_v1  ;;  %62 = vst.msk [vmem:[#allocation3] sm:$0xff] %vm61_vm0, %v1618_v1  ;;  %63 = vst.msk [vmem:[#allocation4] sm:$0xff] %vm61_vm0, %v1618_v1  ;;  %vm81_vm2 = vcmask 130048   ;;  %v72_v2 = vld [vmem:[#allocation5] sm:$0xff]  ;;  %v73_v3 = vld [vmem:[#allocation5 + $0x8] sm:$0xff]  ;;  %v223_v28 = vlaneseq  ;;  %s1620_s24 = smov 32  }
  0x27   :  { %v64_v4 = vld [vmem:[%s1935_s0] sm:$0xff]  ;;  %v1452_v5 = vpack.c.bf16 %v73_v3, %v72_v2  ;;  %v220_v7 = vld [vmem:[#allocation7 + $0x8] sm:$0xff]  ;;  %v221_v10 = vld [vmem:[#allocation7 + $0x10] sm:$0xff]  ;;  %s1621_s9 = smov 96   ;;  %vm1152_vm6 = vcmask 523264  }
  0x28   :  { %1322 = vmatprep.mubr.msk.f32.mxu0 %vm81_vm2, %v64_v4  ;;  %v219_v6 = vld [vmem:[#allocation7] sm:$0xff]  ;;  %v65_v9 = vld [vmem:[%s1935_s0 + $0x8] sm:$0xff]  ;;  %v222_v11 = vld [vmem:[#allocation7 + $0x18] sm:$0xff]  ;;  %v224_v33 = vand.u32 127, %v223_v28 }
  0x29   :  { %v1702_v8 = vpack.c.bf16 %v220_v7, %v219_v6  ;;  %1453 = vmatprep.subr.bf16.mxu0 %v1452_v5  ;;  %v66_v12 = vld [vmem:[%s1935_s0 + $0x10] sm:$0xff]  ;;  %v1714_v13 = vpack.c.bf16 %v222_v11, %v221_v10  ;;  %v67_v14 = vld [vmem:[%s1935_s0 + $0x18] sm:$0xff]  ;;  %v68_v15 = vld [vmem:[%s1935_s0 + $0x20] sm:$0xff] }
  0x2a   :  { %1455 = vmatpush3.bf16.msra.mxu0 %v1452_v5  ;;  %v69_v16 = vld [vmem:[%s1935_s0 + $0x28] sm:$0xff]  ;;  %v70_v17 = vld [vmem:[%s1935_s0 + $0x30] sm:$0xff]  ;;  %v71_v18 = vld [vmem:[%s1935_s0 + $0x38] sm:$0xff]  ;;  %vm225_vm3 = vcmp.ge.s32.totalorder %v224_v33, 64  ;;  %vm226_vm4 = vcmp.lt.s32.totalorder %v224_v33, 96 }
  0x2b   :  { %1464 = vmatpush3.bf16.msra.mxu1 %v1702_v8  ;;  %1456 = vmatprep.subr.bf16.mxu0 %v1616_v0  ;;  %v1233_v20 = vld [vmem:[%s1938_s3] ss:$0 sm:$0xff]  ;;  %vm1767_vm5 = vmand %vm225_vm3, %vm226_vm4  ;;  %s1619_s3 = smov 64   ;;  %v1055_v42 = vld [vmem:[%s1939_s4 + $0x10] sm:$0xff] }
  0x2c   :  { %1465 = vmatprep.subr.bf16.mxu1 %v1616_v0 }
  0x2d   :  { %1323 = vmatmul.mubr.msk.f32.vlgmr.msra.gmra.mrb[0].mxu0 %vm81_vm2, %v65_v9  ;;  %v228_v19 = vld [vmem:[#allocation3] sm:$0xff]  ;;  %v229_v49 = vld [vmem:[#allocation4] sm:$0xff] }
  0x2e   :  { %1458 = vmatpush3.bf16.msra.mxu0 %v1702_v8  ;;  %1325 = vmatprep.mubr.msk.f32.mxu0 %vm81_vm2, %v66_v12 }
  0x2f   :  { %1459 = vmatprep.subr.bf16.mxu0 %v1616_v0  ;;  %1467 = vmatpush3.bf16.msra.mxu1 %v1714_v13 }
  0x30   :  { %1474 = vmatprep.subr.bf16.mxu1 %v1616_v0 }
  0x31   :  { %1326 = vmatmul.mubr.msk.f32.gmra.mrb[2].mxu0 %vm81_vm2, %v67_v14 }
  0x32   :  { %1328 = vmatprep.mubr.msk.f32.mxu0 %vm81_vm2, %v68_v15  ;;  %1461 = vmatpush3.bf16.msra.mxu0 %v1714_v13 }
  0x33   :  { %1468 = vmatprep.subr.bf16.mxu0 %v1616_v0 }
  0x35   :  { %1329 = vmatmul.mubr.msk.f32.gmra.mrb[4].mxu0 %vm81_vm2, %v69_v16 }
  0x36   :  { %1331 = vmatprep.mubr.msk.f32.mxu0 %vm81_vm2, %v70_v17 }
  0x39   :  { %1332 = vmatmul.mubr.msk.f32.gmra.mrb[6].mxu0 %vm81_vm2, %v71_v18 }
  0x3a   :  { %1342 = vmatprep.mubr.msk.f32.mxu0 %vm1617_vm1, %v1618_v1 }
  0x3d   :  { %1343 = vmatmul.mubr.msk.f32.vlgmr.msra.gmra.mrb[8].mxu0 %vm61_vm0, %v228_v19 }
  0x3e   :  { %1470 = vmatpush3.bf16.msra.mxu0 %v1702_v8  ;;  %1364 = vmatprep.mubr.msk.f32.mxu0 %vm1617_vm1, %v1618_v1 }
  0x3f   :  { %1471 = vmatprep.subr.bf16.mxu0 %v1616_v0 }
  0x42   :  { %1473 = vmatpush3.bf16.msra.mxu0 %v1714_v13 }
  0x43   :  { %1480 = vmatprep.subr.bf16.mxu0 %v1616_v0 }
 0x100   :  { %v1324_v21 = vpop.f32.mrb[0].mxu0 }
 0x101   :  { %v178_v22 = vadd.f32 %v1324_v21, %v1233_v20  ;;  %v172_v23 = vpop.f32.mrb[1].mxu0 }
 0x102   :  { %v173_v38 = vadd.f32 %v1233_v20, %v172_v23 }
 0x104   :  { %v1327_v24 = vpop.f32.mrb[2].mxu0 }
 0x105   :  { %v1755_v25 = vadd.f32 %v1327_v24, %v1233_v20  ;;  %v182_v26 = vpop.f32.mrb[3].mxu0 }
 0x106   :  { %v1757_v27 = vadd.f32 %v1233_v20, %v182_v26 }
 0x108   :  { %v1330_v29 = vpop.f32.mrb[4].mxu0 }
 0x109   :  { %v1759_v30 = vadd.f32 %v1330_v29, %v1233_v20  ;;  %v192_v31 = vpop.f32.mrb[5].mxu0 }
 0x10a   :  { %v1761_v32 = vadd.f32 %v1233_v20, %v192_v31 }
 0x10c   :  { %v1333_v34 = vpop.f32.mrb[6].mxu0 }
 0x10d   :  { %v1763_v35 = vadd.f32 %v1333_v34, %v1233_v20  ;;  %v202_v36 = vpop.f32.mrb[7].mxu0 }
 0x10e   :  { %v1765_v37 = vadd.f32 %v1233_v20, %v202_v36 }
 0x110   :  { %v301_v39 = vpop.f32.mrb[8].mxu0 }
 0x111   :  { %v305_v40 = vadd.f32 %v301_v39, %v173_v38  ;;  %v1344_v41 = vpop.f32.mrb[9].mxu0 }
 0x113   :  { %v306_v43 = vmul.f32 0.5, %v305_v40 }
 0x115   :  { %v307_v44 = vsel %vm1767_vm5, %v305_v40, %v306_v43 }
 0x116   :  { %1532 = vtanh.f32 %v307_v44 }
 0x120   :  { %v1533_v45 = vpop.eup %1532 }
 0x121   :  { %v309_v46 = vadd.f32 1.0, %v1533_v45 }
 0x123   :  { %v310_v47 = vmul.f32 0.5, %v309_v46 }
 0x125   :  { %v311_v48 = vsel %vm1767_vm5, %v1533_v45, %v310_v47 }
 0x126   :  { %318 = vrot.lane.b32.xlu0 %v311_v48, %s1619_s3 }
 0x12a   :  { %313 = vrot.lane.b32.xlu0 %v229_v49, %s1620_s24 }
 0x198   :  { %v319_v50 = vpop.permute.xlu0 %318 }
 0x199   :  { %v321_v51 = vmul.f32 %v319_v50, %v311_v48 }
 0x19b   :  { %323 = vrot.lane.b32.xlu1 %v321_v51, %s1620_s24 }
 0x19c   :  { %v314_v52 = vpop.permute.xlu0 %313 }
 0x19d   :  { %v316_v53 = vmul.f32 %v314_v52, %v311_v48 }
 0x20d   :  { %v324_v54 = vpop.permute.xlu1 %323 }
 0x20e   :  { %v326_v55 = vadd.f32 %v324_v54, %v316_v53 }
 0x210   :  { %1534 = vtanh.f32 %v326_v55 }
 0x21a   :  { %v1535_v56 = vpop.eup %1534 }
 0x21b   :  { %329 = vrot.lane.b32.xlu1 %v1535_v56, %s1619_s3 }
 0x28d   :  { %v330_v57 = vpop.permute.xlu1 %329 }
 0x28e   :  { %v332_v58 = vmul.f32 %v330_v57, %v311_v48 }
 0x290   :  { %336 = vrot.lane.b32.xlu0 %v332_v58, %s1620_s24 }
 0x302   :  { %v337_v59 = vpop.permute.xlu0 %336 }
 0x303   :  { %1354 = vmatmul.mubr.msk.f32.vlgmr.msra.gmra.mrb[0].mxu1 %vm61_vm0, %v337_v59 }
 0x304   :  { %1476 = vmatpush3.bf16.msra.mxu1 %v1702_v8  ;;  %1375 = vmatprep.mubr.msk.f32.mxu1 %vm1617_vm1, %v1618_v1 }
 0x305   :  { %1477 = vmatprep.subr.bf16.mxu1 %v1616_v0 }
 0x308   :  { %1479 = vmatpush3.bf16.msra.mxu1 %v1714_v13 }
 0x309   :  { %1486 = vmatprep.subr.bf16.mxu1 %v1616_v0 }
 0x3d6   :  { %v406_v60 = vpop.f32.mrb[0].mxu1 }
 0x3d7   :  { %v410_v61 = vadd.f32 %v406_v60, %v178_v22  ;;  %v1355_v62 = vpop.f32.mrb[1].mxu1 }
 0x3d9   :  { %v411_v63 = vmul.f32 0.5, %v410_v61 }
 0x3db   :  { %v412_v2 = vsel %vm1767_vm5, %v410_v61, %v411_v63 }
 0x3dc   :  { %1536 = vtanh.f32 %v412_v2 }
 0x3e6   :  { %v1537_v3 = vpop.eup %1536 }
 0x3e7   :  { %v414_v4 = vadd.f32 1.0, %v1537_v3 }
 0x3e9   :  { %v415_v5 = vmul.f32 0.5, %v414_v4 }
 0x3eb   :  { %v416_v6 = vsel %vm1767_vm5, %v1537_v3, %v415_v5 }
 0x3ec   :  { %419 = vrot.lane.b32.xlu1 %v416_v6, %s1619_s3  ;;  %v417_v10 = vmul.f32 %v416_v6, %v326_v55 }
 0x45e   :  { %v420_v7 = vpop.permute.xlu1 %419 }
 0x45f   :  { %v422_v9 = vmul.f32 %v420_v7, %v416_v6 }
 0x461   :  { %424 = vrot.lane.b32.xlu0 %v422_v9, %s1620_s24 }
 0x4d3   :  { %v425_v11 = vpop.permute.xlu0 %424 }
 0x4d4   :  { %v427_v12 = vadd.f32 %v425_v11, %v417_v10 }
 0x4d6   :  { %1538 = vtanh.f32 %v427_v12 }
 0x4e0   :  { %v1539_v14 = vpop.eup %1538 }
 0x4e1   :  { %430 = vrot.lane.b32.xlu1 %v1539_v14, %s1619_s3 }
 0x553   :  { %v431_v15 = vpop.permute.xlu1 %430 }
 0x554   :  { %v433_v16 = vmul.f32 %v431_v15, %v416_v6 }
 0x556   :  { %437 = vrot.lane.b32.xlu0 %v433_v16, %s1620_s24 }
 0x5c8   :  { %v438_v17 = vpop.permute.xlu0 %437 }
 0x5c9   :  { %1365 = vmatmul.mubr.msk.f32.vlgmr.msra.gmra.mrb[10].mxu0 %vm61_vm0, %v438_v17 }
 0x5ca   :  { %1482 = vmatpush3.bf16.msra.mxu0 %v1702_v8  ;;  %1386 = vmatprep.mubr.msk.f32.mxu0 %vm1617_vm1, %v1618_v1 }
 0x5cb   :  { %1483 = vmatprep.subr.bf16.mxu0 %v1616_v0 }
 0x5ce   :  { %1485 = vmatpush3.bf16.msra.mxu0 %v1714_v13 }
 0x5cf   :  { %1492 = vmatprep.subr.bf16.mxu0 %v1616_v0 }
 0x69c   :  { %v507_v18 = vpop.f32.mrb[10].mxu0 }
 0x69d   :  { %v511_v19 = vadd.f32 %v507_v18, %v1757_v27  ;;  %v1366_v20 = vpop.f32.mrb[11].mxu0 }
 0x69f   :  { %v512_v21 = vmul.f32 0.5, %v511_v19 }
 0x6a1   :  { %v513_v22 = vsel %vm1767_vm5, %v511_v19, %v512_v21 }
 0x6a2   :  { %1540 = vtanh.f32 %v513_v22 }
 0x6ac   :  { %v1541_v23 = vpop.eup %1540 }
 0x6ad   :  { %v515_v24 = vadd.f32 1.0, %v1541_v23 }
 0x6af   :  { %v516_v26 = vmul.f32 0.5, %v515_v24 }
 0x6b1   :  { %v517_v28 = vsel %vm1767_vm5, %v1541_v23, %v516_v26 }
 0x6b2   :  { %520 = vrot.lane.b32.xlu1 %v517_v28, %s1619_s3  ;;  %v518_v33 = vmul.f32 %v517_v28, %v427_v12 }
 0x724   :  { %v521_v29 = vpop.permute.xlu1 %520 }
 0x725   :  { %v523_v31 = vmul.f32 %v521_v29, %v517_v28 }
 0x727   :  { %525 = vrot.lane.b32.xlu0 %v523_v31, %s1620_s24 }
 0x799   :  { %v526_v27 = vpop.permute.xlu0 %525 }
 0x79a   :  { %v528_v34 = vadd.f32 %v526_v27, %v518_v33 }
 0x79c   :  { %1542 = vtanh.f32 %v528_v34 }
 0x7a6   :  { %v1543_v36 = vpop.eup %1542 }
 0x7a7   :  { %531 = vrot.lane.b32.xlu1 %v1543_v36, %s1619_s3 }
 0x819   :  { %v532_v38 = vpop.permute.xlu1 %531 }
 0x81a   :  { %v534_v39 = vmul.f32 %v532_v38, %v517_v28 }
 0x81c   :  { %538 = vrot.lane.b32.xlu0 %v534_v39, %s1620_s24 }
 0x88e   :  { %v539_v40 = vpop.permute.xlu0 %538 }
 0x88f   :  { %1376 = vmatmul.mubr.msk.f32.vlgmr.msra.gmra.mrb[2].mxu1 %vm61_vm0, %v539_v40 }
 0x890   :  { %1488 = vmatpush3.bf16.msra.mxu1 %v1702_v8  ;;  %1397 = vmatprep.mubr.msk.f32.mxu1 %vm1617_vm1, %v1618_v1 }
 0x891   :  { %1489 = vmatprep.subr.bf16.mxu1 %v1616_v0 }
 0x894   :  { %1491 = vmatpush3.bf16.msra.mxu1 %v1714_v13 }
 0x895   :  { %1498 = vmatprep.subr.bf16.mxu1 %v1616_v0 }
 0x962   :  { %v608_v41 = vpop.f32.mrb[2].mxu1 }
 0x963   :  { %v612_v43 = vadd.f32 %v608_v41, %v1755_v25  ;;  %v1377_v44 = vpop.f32.mrb[3].mxu1 }
 0x965   :  { %v613_v45 = vmul.f32 0.5, %v612_v43 }
 0x967   :  { %v614_v46 = vsel %vm1767_vm5, %v612_v43, %v613_v45 }
 0x968   :  { %1544 = vtanh.f32 %v614_v46 }
 0x972   :  { %v1545_v47 = vpop.eup %1544 }
 0x973   :  { %v616_v48 = vadd.f32 1.0, %v1545_v47 }
 0x975   :  { %v617_v49 = vmul.f32 0.5, %v616_v48 }
 0x977   :  { %v618_v50 = vsel %vm1767_vm5, %v1545_v47, %v617_v49 }
 0x978   :  { %621 = vrot.lane.b32.xlu1 %v618_v50, %s1619_s3  ;;  %v619_v53 = vmul.f32 %v618_v50, %v528_v34 }
 0x9ea   :  { %v622_v51 = vpop.permute.xlu1 %621 }
 0x9eb   :  { %v624_v52 = vmul.f32 %v622_v51, %v618_v50 }
 0x9ed   :  { %626 = vrot.lane.b32.xlu0 %v624_v52, %s1620_s24 }
 0xa5f   :  { %v627_v25 = vpop.permute.xlu0 %626 }
 0xa60   :  { %v629_v54 = vadd.f32 %v627_v25, %v619_v53 }
 0xa62   :  { %1546 = vtanh.f32 %v629_v54 }
 0xa6c   :  { %v1547_v55 = vpop.eup %1546 }
 0xa6d   :  { %632 = vrot.lane.b32.xlu1 %v1547_v55, %s1619_s3 }
 0xadf   :  { %v633_v56 = vpop.permute.xlu1 %632 }
 0xae0   :  { %v635_v57 = vmul.f32 %v633_v56, %v618_v50 }
 0xae2   :  { %639 = vrot.lane.b32.xlu0 %v635_v57, %s1620_s24 }
 0xb54   :  { %v640_v58 = vpop.permute.xlu0 %639 }
 0xb55   :  { %1387 = vmatmul.mubr.msk.f32.vlgmr.msra.gmra.mrb[12].mxu0 %vm61_vm0, %v640_v58 }
 0xb56   :  { %1494 = vmatpush3.bf16.msra.mxu0 %v1702_v8  ;;  %1408 = vmatprep.mubr.msk.f32.mxu0 %vm1617_vm1, %v1618_v1 }
 0xb57   :  { %1495 = vmatprep.subr.bf16.mxu0 %v1616_v0 }
 0xb5a   :  { %1497 = vmatpush3.bf16.msra.mxu0 %v1714_v13 }
 0xb5b   :  { %1504 = vmatprep.subr.bf16.mxu0 %v1616_v0 }
 0xc28   :  { %v709_v59 = vpop.f32.mrb[12].mxu0 }
 0xc29   :  { %v713_v60 = vadd.f32 %v709_v59, %v1761_v32  ;;  %v1388_v61 = vpop.f32.mrb[13].mxu0 }
 0xc2b   :  { %v714_v62 = vmul.f32 0.5, %v713_v60 }
 0xc2d   :  { %v715_v63 = vsel %vm1767_vm5, %v713_v60, %v714_v62 }
 0xc2e   :  { %1548 = vtanh.f32 %v715_v63 }
 0xc38   :  { %v1549_v2 = vpop.eup %1548 }
 0xc39   :  { %v717_v3 = vadd.f32 1.0, %v1549_v2 }
 0xc3b   :  { %v718_v4 = vmul.f32 0.5, %v717_v3  ;;  %v1053_v3 = vld [vmem:[%s1939_s4] sm:$0xff] }
 0xc3d   :  { %v719_v5 = vsel %vm1767_vm5, %v1549_v2, %v718_v4  ;;  %v1054_v4 = vld [vmem:[%s1939_s4 + $0x8] sm:$0xff] }
 0xc3e   :  { %722 = vrot.lane.b32.xlu1 %v719_v5, %s1619_s3  ;;  %v720_v9 = vmul.f32 %v719_v5, %v629_v54 }
 0xcb0   :  { %v723_v6 = vpop.permute.xlu1 %722 }
 0xcb1   :  { %v725_v7 = vmul.f32 %v723_v6, %v719_v5  ;;  %v1056_v6 = vld [vmem:[%s1939_s4 + $0x18] sm:$0xff] }
 0xcb3   :  { %727 = vrot.lane.b32.xlu0 %v725_v7, %s1620_s24  ;;  %v1508_v7 = vpack.c.bf16 %v1056_v6, %v1055_v42 }
 0xd25   :  { %v728_v32 = vpop.permute.xlu0 %727 }
 0xd26   :  { %v730_v10 = vadd.f32 %v728_v32, %v720_v9  ;;  %v1137_v32 = vld [vmem:[%s1941_s6] sm:$0xff] }
 0xd28   :  { %1550 = vtanh.f32 %v730_v10 }
 0xd32   :  { %v1551_v11 = vpop.eup %1550 }
 0xd33   :  { %733 = vrot.lane.b32.xlu1 %v1551_v11, %s1619_s3  ;;  %v1139_v11 = vld [vmem:[%s1941_s6 + $0x10] sm:$0xff] }
 0xda5   :  { %v734_v12 = vpop.permute.xlu1 %733 }
 0xda6   :  { %v736_v14 = vmul.f32 %v734_v12, %v719_v5  ;;  %v1505_v5 = vpack.c.bf16 %v1054_v4, %v1053_v3 }
 0xda8   :  { %740 = vrot.lane.b32.xlu0 %v736_v14, %s1620_s24  ;;  %v1140_v14 = vld [vmem:[%s1941_s6 + $0x18] sm:$0xff] }
 0xe1a   :  { %v741_v15 = vpop.permute.xlu0 %740 }
 0xe1b   :  { %1398 = vmatmul.mubr.msk.f32.vlgmr.msra.gmra.mrb[4].mxu1 %vm61_vm0, %v741_v15  ;;  %v1514_v15 = vpack.c.bf16 %v1140_v14, %v1139_v11 }
 0xe1c   :  { %1500 = vmatpush3.bf16.msra.mxu1 %v1702_v8  ;;  %1419 = vmatprep.mubr.msk.f32.mxu1 %vm1617_vm1, %v1618_v1 }
 0xe1d   :  { %1501 = vmatprep.subr.bf16.mxu1 %v1616_v0 }
 0xe20   :  { %1503 = vmatpush3.bf16.msra.mxu1 %v1714_v13 }
 0xe21   :  { %1510 = vmatprep.subr.bf16.mxu1 %v1616_v0 }
 0xeee   :  { %v810_v16 = vpop.f32.mrb[4].mxu1 }
 0xeef   :  { %v814_v17 = vadd.f32 %v810_v16, %v1759_v30  ;;  %v1399_v18 = vpop.f32.mrb[5].mxu1  ;;  %v1141_v16 = vld [vmem:[%s1941_s6 + $0x20] sm:$0xff] }
 0xef1   :  { %v815_v19 = vmul.f32 0.5, %v814_v17 }
 0xef3   :  { %v816_v20 = vsel %vm1767_vm5, %v814_v17, %v815_v19  ;;  %v1142_v17 = vld [vmem:[%s1941_s6 + $0x28] sm:$0xff] }
 0xef4   :  { %1552 = vtanh.f32 %v816_v20  ;;  %v1517_v18 = vpack.c.bf16 %v1142_v17, %v1141_v16 }
 0xefe   :  { %v1553_v21 = vpop.eup %1552 }
 0xeff   :  { %v818_v8 = vadd.f32 1.0, %v1553_v21 }
 0xf01   :  { %v819_v22 = vmul.f32 0.5, %v818_v8 }
 0xf03   :  { %v820_v23 = vsel %vm1767_vm5, %v1553_v21, %v819_v22  ;;  %v1143_v22 = vld [vmem:[%s1941_s6 + $0x30] sm:$0xff] }
 0xf04   :  { %823 = vrot.lane.b32.xlu1 %v820_v23, %s1619_s3  ;;  %v821_v26 = vmul.f32 %v820_v23, %v730_v10  ;;  %v1138_v10 = vld [vmem:[%s1941_s6 + $0x8] sm:$0xff] }
 0xf05   :  { %v1511_v12 = vpack.c.bf16 %v1138_v10, %v1137_v32 }
 0xf76   :  { %v824_v13 = vpop.permute.xlu1 %823 }
 0xf77   :  { %v826_v24 = vmul.f32 %v824_v13, %v820_v23 }
 0xf79   :  { %828 = vrot.lane.b32.xlu0 %v826_v24, %s1620_s24 }
 0xfeb   :  { %v829_v30 = vpop.permute.xlu0 %828 }
 0xfec   :  { %v831_v28 = vadd.f32 %v829_v30, %v821_v26 }
 0xfee   :  { %1554 = vtanh.f32 %v831_v28 }
 0xff8   :  { %v1555_v29 = vpop.eup %1554 }
 0xff9   :  { %834 = vrot.lane.b32.xlu1 %v1555_v29, %s1619_s3  ;;  %v1252_v29 = vld [vmem:[%s1942_s7] ss:$0 sm:$0xff] }
0x106b   :  { %v835_v31 = vpop.permute.xlu1 %834 }
0x106c   :  { %v837_v33 = vmul.f32 %v835_v31, %v820_v23  ;;  %v1144_v23 = vld [vmem:[%s1941_s6 + $0x38] sm:$0xff] }
0x106d   :  { %v1520_v13 = vpack.c.bf16 %v1144_v23, %v1143_v22 }
0x106e   :  { %841 = vrot.lane.b32.xlu0 %v837_v33, %s1620_s24 }
0x10e0   :  { %v842_v27 = vpop.permute.xlu0 %841 }
0x10e1   :  { %1409 = vmatmul.mubr.msk.f32.vlgmr.msra.gmra.mrb[14].mxu0 %vm61_vm0, %v842_v27 }
0x10e2   :  { %1430 = vmatprep.mubr.msk.f32.mxu0 %vm1617_vm1, %v1618_v1  ;;  %1506 = vmatpush3.bf16.msra.mxu0 %v1505_v5 }
0x10e3   :  { %1507 = vmatprep.subr.bf16.mxu0 %v1616_v0 }
0x10e6   :  { %1509 = vmatpush3.bf16.msra.mxu0 %v1508_v7 }
0x11b4   :  { %v911_v34 = vpop.f32.mrb[14].mxu0 }
0x11b5   :  { %v915_v36 = vadd.f32 %v911_v34, %v1765_v37  ;;  %v1410_v38 = vpop.f32.mrb[15].mxu0 }
0x11b7   :  { %v916_v39 = vmul.f32 0.5, %v915_v36 }
0x11b9   :  { %v917_v40 = vsel %vm1767_vm5, %v915_v36, %v916_v39 }
0x11ba   :  { %1556 = vtanh.f32 %v917_v40 }
0x11c4   :  { %v1557_v41 = vpop.eup %1556 }
0x11c5   :  { %v919_v43 = vadd.f32 1.0, %v1557_v41 }
0x11c7   :  { %v920_v44 = vmul.f32 0.5, %v919_v43 }
0x11c9   :  { %v921_v45 = vsel %vm1767_vm5, %v1557_v41, %v920_v44 }
0x11ca   :  { %924 = vrot.lane.b32.xlu1 %v921_v45, %s1619_s3  ;;  %v922_v48 = vmul.f32 %v921_v45, %v831_v28 }
0x123c   :  { %v925_v46 = vpop.permute.xlu1 %924 }
0x123d   :  { %v927_v47 = vmul.f32 %v925_v46, %v921_v45 }
0x123f   :  { %929 = vrot.lane.b32.xlu0 %v927_v47, %s1620_s24 }
0x12b1   :  { %v930_v37 = vpop.permute.xlu0 %929 }
0x12b2   :  { %v932_v49 = vadd.f32 %v930_v37, %v922_v48 }
0x12b4   :  { %1558 = vtanh.f32 %v932_v49 }
0x12be   :  { %v1559_v50 = vpop.eup %1558 }
0x12bf   :  { %935 = vrot.lane.b32.xlu1 %v1559_v50, %s1619_s3 }
0x1331   :  { %v936_v51 = vpop.permute.xlu1 %935 }
0x1332   :  { %v938_v52 = vmul.f32 %v936_v51, %v921_v45 }
0x1334   :  { %942 = vrot.lane.b32.xlu0 %v938_v52, %s1620_s24 }
0x13a6   :  { %v943_v53 = vpop.permute.xlu0 %942 }
0x13a7   :  { %1420 = vmatmul.mubr.msk.f32.vlgmr.msra.gmra.mrb[6].mxu1 %vm61_vm0, %v943_v53 }
0x13a8   :  { %1449 = vmatprep.mubr.msk.f32.mxu1 %vm1617_vm1, %v1618_v1  ;;  %1512 = vmatpush3.bf16.msra.mxu1 %v1511_v12 }
0x13a9   :  { %1513 = vmatprep.subr.bf16.mxu1 %v1616_v0 }
0x13ac   :  { %1515 = vmatpush3.bf16.msra.mxu1 %v1514_v15 }
0x13ad   :  { %1516 = vmatprep.subr.bf16.mxu1 %v1616_v0 }
0x13b0   :  { %1518 = vmatpush3.bf16.msra.mxu1 %v1517_v18 }
0x13b1   :  { %1519 = vmatprep.subr.bf16.mxu1 %v1616_v0  ;;  %v1250_v0 = vld [vmem:[%s1940_s5] ss:$0 sm:$0xff] }
0x13b4   :  { %1521 = vmatpush3.bf16.msra.mxu1 %v1520_v13 }
0x147a   :  { %v1012_v25 = vpop.f32.mrb[6].mxu1 }
0x147b   :  { %v1016_v54 = vadd.f32 %v1012_v25, %v1763_v35  ;;  %v1421_v55 = vpop.f32.mrb[7].mxu1 }
0x147d   :  { %v1017_v56 = vmul.f32 0.5, %v1016_v54 }
0x147f   :  { %v1018_v57 = vsel %vm1767_vm5, %v1016_v54, %v1017_v56 }
0x1480   :  { %1560 = vtanh.f32 %v1018_v57 }
0x148a   :  { %v1561_v58 = vpop.eup %1560 }
0x148b   :  { %v1020_v59 = vadd.f32 1.0, %v1561_v58 }
0x148d   :  { %v1021_v60 = vmul.f32 0.5, %v1020_v59 }
0x148f   :  { %v1022_v61 = vsel %vm1767_vm5, %v1561_v58, %v1021_v60 }
0x1490   :  { %1025 = vrot.lane.b32.xlu1 %v1022_v61, %s1619_s3  ;;  %v1023_v1 = vmul.f32 %v1022_v61, %v932_v49 }
0x1502   :  { %v1026_v62 = vpop.permute.xlu1 %1025 }
0x1503   :  { %v1028_v63 = vmul.f32 %v1026_v62, %v1022_v61 }
0x1505   :  { %1030 = vrot.lane.b32.xlu0 %v1028_v63, %s1620_s24 }
0x1577   :  { %v1031_v35 = vpop.permute.xlu0 %1030 }
0x1578   :  { %v1033_v2 = vadd.f32 %v1031_v35, %v1023_v1 }
0x157a   :  { %1562 = vtanh.f32 %v1033_v2 }
0x1584   :  { %v1563_v9 = vpop.eup %1562 }
0x1585   :  { %1036 = vrot.lane.b32.xlu1 %v1563_v9, %s1619_s3 }
0x1589   :  { %1046 = vrot.lane.b32.xlu1 %v1033_v2, %s1621_s9 }
0x15f7   :  { %v1037_v19 = vpop.permute.xlu1 %1036 }
0x15f8   :  { %v1039_v20 = vmul.f32 %v1037_v19, %v1022_v61 }
0x15fa   :  { %1041 = vrot.lane.b32.xlu0 %v1039_v20, %s1620_s24 }
0x15fb   :  { %v1047_v21 = vpop.permute.xlu1 %1046 }
0x15fc   :  { %1049 = vst.msk [vmem:[#allocation4] sm:$0xff] %vm61_vm0, %v1047_v21 }
0x166c   :  { %v1042_v8 = vpop.permute.xlu0 %1041 }
0x166d   :  { %1044 = vst.msk [vmem:[#allocation3] sm:$0xff] %vm61_vm0, %v1042_v8  ;;  %1431 = vmatmul.mubr.msk.f32.vlgmr.msra.gmra.mrb[16].mxu0 %vm61_vm0, %v1042_v8 }
0x1740   :  { %v1132_v24 = vpop.f32.mrb[16].mxu0 }
0x1741   :  { %v1133_v26 = vadd.f32 %v1250_v0, %v1132_v24  ;;  %v1432_v30 = vpop.f32.mrb[17].mxu0 }
0x1743   :  { %v1136_v28 = vmax.f32 %v1133_v26, 0.0 }
0x1745   :  { %1450 = vmatmul.mubr.msk.f32.vlgmr.msra.gmra.mrb[8].mxu1 %vm1152_vm6, %v1136_v28 }
0x1818   :  { %v1222_v31 = vpop.f32.mrb[8].mxu1 }
0x1819   :  { %v1223_v33 = vadd.f32 %v1252_v29, %v1222_v31  ;;  %v1451_v27 = vpop.f32.mrb[9].mxu1 }
0x181b   :  { %1226 = vst [vmem:[%s1943_s8] sm:$0xff] %v1223_v33 }
0x181c   :  { %1231 = vsyncpa [#allocation6], 1 }
0x181d   :  { %1232 = vsyncpa [#allocation8], 1 }

</bundles_post_ra>
